<compile_context>
chip_gen: v7x
topology: tpu7x:2x2x1
jax: 0.10.0
libtpu: 0.0.40
codegen_flags: <defaults>
</compile_context>

<pallas_src>
import functools

import jax
import jax.numpy as jnp
from jax.experimental import pallas as pl
from jax.experimental.pallas import tpu as pltpu

SELU_ALPHA = 1.6732632423543772
SELU_SCALE = 1.0507009873554805

LANES = 128
SUBLANES_BF16 = 16


def _selu(v):
    # F.selu: scale * (max(0,x) + min(0, alpha*(exp(x)-1)))
    return SELU_SCALE * jnp.where(v > 0, v, SELU_ALPHA * (jnp.exp(v) - 1.0))


def _round_up(n, m):
    return ((n + m - 1) // m) * m


def _cdiv(a, b):
    return (a + b - 1) // b


def mlp_kernel(x_ref, wp_ref, bp_ref, out_ref, *, n_layers, n_out, din, dcol):
    # bf16 activations / weights feed the MXU natively; accumulation is f32.
    h = x_ref[...]                                    # (tb, din) bf16
    logits = None
    for l in range(n_layers):                         # short, unrolled at trace time
        k = din if l == 0 else dcol
        w = wp_ref[l, :k, :]                          # (k, dcol) bf16, static slice
        b = bp_ref[l].astype(jnp.float32)             # (1, dcol)
        acc = jnp.dot(h, w, preferred_element_type=jnp.float32) + b
        act = _selu(acc)                              # f32
        if l < n_layers - 1:
            h = act.astype(x_ref.dtype)               # back to bf16 for next MXU op
        else:
            logits = act                              # (tb, dcol) f32

    # Masked log_softmax over only the real n_out logits.  Padded W/b columns
    # are zero -> padded logits are SELU(0)=0 and MUST be excluded here.
    col = jax.lax.broadcasted_iota(jnp.int32, logits.shape, dimension=1)
    valid = col < n_out
    neg = jnp.where(valid, logits, -jnp.inf)
    m = jnp.max(neg, axis=-1, keepdims=True)
    s = neg - m
    e = jnp.where(valid, jnp.exp(s), 0.0)
    lse = jnp.log(jnp.sum(e, axis=-1, keepdims=True))
    # Padded lanes end up -inf; the wrapper's [:, :n_out] slice drops them.
    out_ref[...] = (s - lse).astype(out_ref.dtype)


def net_forward(x, params, *, block_batch=2048,
                transfer_dtype=jnp.bfloat16, out_dtype=jnp.bfloat16):
    """x: [batch, in_features]. params: list of (W, b), W=(in,out), b=(1,out).

    Returns [batch, n_out] log-probabilities in `out_dtype`.
    """
    batch, in_features = x.shape
    n_layers = len(params)
    n_out = params[-1][0].shape[1]

    # Lane-dense packing dims: every layer output padded to a multiple of 128,
    # layer-0 input likewise.
    dcol = _round_up(max(w.shape[1] for w, _ in params), LANES)
    din = _round_up(in_features, LANES)
    drow = max(din, dcol)

    # Pack all weights/biases into two small resident tensors (DMA'd to VMEM
    # once thanks to constant index maps).
    wp = jnp.zeros((n_layers, drow, dcol), transfer_dtype)
    bp = jnp.zeros((n_layers, 1, dcol), transfer_dtype)
    for l, (w, b) in enumerate(params):
        wp = wp.at[l, :w.shape[0], :w.shape[1]].set(w.astype(transfer_dtype))
        bp = bp.at[l, 0, :b.shape[1]].set(b.reshape(-1).astype(transfer_dtype))

    # Batch tile: multiple of 16 (bf16 sublanes), capped by block_batch and so
    # the grid keeps >= 2 steps for moderate batches (feeds both v7x TCs via
    # the "parallel" axis; harmless on single-TC v5e/v6e).
    tb = min(block_batch, _round_up(_cdiv(batch, 2), SUBLANES_BF16))
    tb = _round_up(max(tb, SUBLANES_BF16), SUBLANES_BF16)
    batch_pad = _round_up(batch, tb)
    grid = (batch_pad // tb,)

    x_p = jnp.zeros((batch_pad, din), transfer_dtype)
    x_p = x_p.at[:batch, :in_features].set(x.astype(transfer_dtype))

    # VMEM budget: double-buffered in/out blocks + resident weights + f32
    # working set for the unrolled layers.  Keep >= any scoped default and
    # <= v7x physical 64 MiB.
    out_itemsize = jnp.dtype(out_dtype).itemsize
    est = (2 * tb * din * 2 + 2 * tb * dcol * out_itemsize
           + 2 * (wp.size + bp.size) * 2 + 8 * tb * dcol * 4)
    vmem_limit = int(min(max(est * 5 // 4, 32 * 1024 * 1024), 64 * 1024 * 1024))

    kernel = functools.partial(mlp_kernel, n_layers=n_layers, n_out=n_out,
                               din=din, dcol=dcol)

    out = pl.pallas_call(
        kernel,
        out_shape=jax.ShapeDtypeStruct((batch_pad, dcol), out_dtype),
        grid=grid,
        in_specs=[
            pl.BlockSpec((tb, din), lambda i: (i, 0)),
            # Constant index maps: packed weights/biases stay VMEM-resident.
            pl.BlockSpec((n_layers, drow, dcol), lambda i: (0, 0, 0)),
            pl.BlockSpec((n_layers, 1, dcol), lambda i: (0, 0, 0)),
        ],
        out_specs=pl.BlockSpec((tb, dcol), lambda i: (i, 0)),
        compiler_params=pltpu.CompilerParams(
            dimension_semantics=("parallel",),
            vmem_limit_bytes=vmem_limit),
    )(x_p, wp, bp)

    return out[:batch, :n_out]


def init_params(key, input_shape, output_size):
    """Deterministic parameter init (uniform like PyTorch's Linear default)."""
    dims = [(input_shape, 64), (64, 32), (32, 32), (32, 16), (16, output_size)]
    params = []
    for (fan_in, fan_out) in dims:
        key, kw, kb = jax.random.split(key, 3)
        bound = 1.0 / jnp.sqrt(fan_in)
        w = jax.random.uniform(kw, (fan_in, fan_out), jnp.float32, -bound, bound)
        b = jax.random.uniform(kb, (1, fan_out), jnp.float32, -bound, bound)
        params.append((w, b))
    return params


def _ref_forward(x, params, activation_dtype=jnp.float32):
    """Pure-JAX reference; optionally mirrors the kernel's bf16 activations."""
    h = x
    for i, (w, b) in enumerate(params):
        h = _selu(jnp.dot(h, w, preferred_element_type=jnp.float32) + b)
        if i < len(params) - 1:
            h = h.astype(activation_dtype).astype(jnp.float32)
    return jax.nn.log_softmax(h, axis=1)


if __name__ == "__main__":
    INPUT_SHAPE = 32
    OUTPUT_SIZE = 10
    BATCH = 8

    key = jax.random.PRNGKey(0)
    key, kx = jax.random.split(key)
    x = jax.random.normal(kx, (BATCH, INPUT_SHAPE), jnp.float32)

    params = init_params(key, INPUT_SHAPE, OUTPUT_SIZE)

    out = net_forward(x, params)
    out = jax.block_until_ready(out)
    assert out.shape == (BATCH, OUTPUT_SIZE)

    # Reference sees the same bf16-quantized inputs/weights and bf16
    # inter-layer activations the kernel uses.
    xq = x.astype(jnp.bfloat16).astype(jnp.float32)
    pq = [(w.astype(jnp.bfloat16).astype(jnp.float32),
           b.astype(jnp.bfloat16).astype(jnp.float32)) for w, b in params]
    ref = _ref_forward(xq, pq, activation_dtype=jnp.bfloat16)

    outf = out.astype(jnp.float32)
    err = float(jnp.max(jnp.abs(outf - ref)))
    assert bool(jnp.allclose(outf, ref, atol=3e-2, rtol=3e-2)), err

    print("KERNEL_OK")
</pallas_src>

<mosaic_0001>
module attributes {stable_mosaic.version = 11 : i64} {
  func.func @mlp_kernel(%arg0: i32, %arg1: memref<16x128xbf16, #tpu.memory_space<vmem>>, %arg2: memref<5x128x128xbf16, #tpu.memory_space<vmem>>, %arg3: memref<5x1x128xbf16, #tpu.memory_space<vmem>>, %arg4: memref<16x128xbf16, #tpu.memory_space<vmem>>) attributes {dimension_semantics = [#tpu.dimension_semantics<parallel>], iteration_bounds = array<i64: 1>, scalar_prefetch = 0 : i64, scratch_operands = 0 : i64, tpu.core_type = #tpu.core_type<tc>, window_params = [{transform_indices = @transform_0, window_bounds = array<i64: 16, 128>}, {pipeline_mode = #tpu.pipeline_mode<synchronous>, transform_indices = @transform_1, window_bounds = array<i64: 5, 128, 128>}, {pipeline_mode = #tpu.pipeline_mode<synchronous>, transform_indices = @transform_2, window_bounds = array<i64: 5, 1, 128>}, {transform_indices = @transform_3, window_bounds = array<i64: 16, 128>}]} {
    %c0 = arith.constant 0 : index
    %c0_0 = arith.constant 0 : index
    %0 = vector.load %arg1[%c0, %c0_0] : memref<16x128xbf16, #tpu.memory_space<vmem>>, vector<16x128xbf16>
    %c0_1 = arith.constant 0 : index
    %c0_2 = arith.constant 0 : index
    %c0_3 = arith.constant 0 : index
    %1 = vector.load %arg2[%c0_1, %c0_2, %c0_3] : memref<5x128x128xbf16, #tpu.memory_space<vmem>>, vector<1x128x128xbf16>
    %2 = vector.shape_cast %1 : vector<1x128x128xbf16> to vector<128x128xbf16>
    %c0_4 = arith.constant 0 : index
    %c0_5 = arith.constant 0 : index
    %c0_6 = arith.constant 0 : index
    %3 = vector.load %arg3[%c0_4, %c0_5, %c0_6] : memref<5x1x128xbf16, #tpu.memory_space<vmem>>, vector<1x1x128xbf16>
    %4 = vector.shape_cast %3 : vector<1x1x128xbf16> to vector<1x128xbf16>
    %5 = arith.extf %4 : vector<1x128xbf16> to vector<1x128xf32>
    %cst = arith.constant dense<0.000000e+00> : vector<16x128xf32>
    %6 = tpu.matmul %0, %2, %cst {dimension_numbers = #tpu.dot_dimension_numbers<[1], [0], [0], [1], [0, 0, 1, 1], [], []>} : vector<16x128xbf16>, vector<128x128xbf16>, vector<16x128xf32> -> vector<16x128xf32>
    %7 = vector.broadcast %5 : vector<1x128xf32> to vector<16x128xf32>
    %8 = arith.addf %6, %7 : vector<16x128xf32>
    %cst_7 = arith.constant 0.000000e+00 : f32
    %9 = vector.broadcast %cst_7 : f32 to vector<16x128xf32>
    %10 = arith.cmpf ogt, %8, %9 : vector<16x128xf32>
    %11 = math.exp %8 : vector<16x128xf32>
    %cst_8 = arith.constant 1.000000e+00 : f32
    %12 = vector.broadcast %cst_8 : f32 to vector<16x128xf32>
    %13 = arith.subf %11, %12 : vector<16x128xf32>
    %cst_9 = arith.constant 1.67326319 : f32
    %14 = vector.broadcast %cst_9 : f32 to vector<16x128xf32>
    %15 = arith.mulf %14, %13 : vector<16x128xf32>
    %16 = arith.select %10, %8, %15 : vector<16x128xi1>, vector<16x128xf32>
    %cst_10 = arith.constant 1.05070102 : f32
    %17 = vector.broadcast %cst_10 : f32 to vector<16x128xf32>
    %18 = arith.mulf %17, %16 : vector<16x128xf32>
    %19 = arith.truncf %18 : vector<16x128xf32> to vector<16x128xbf16>
    %c1 = arith.constant 1 : index
    %c0_11 = arith.constant 0 : index
    %c0_12 = arith.constant 0 : index
    %20 = vector.load %arg2[%c1, %c0_11, %c0_12] : memref<5x128x128xbf16, #tpu.memory_space<vmem>>, vector<1x128x128xbf16>
    %21 = vector.shape_cast %20 : vector<1x128x128xbf16> to vector<128x128xbf16>
    %c1_13 = arith.constant 1 : index
    %c0_14 = arith.constant 0 : index
    %c0_15 = arith.constant 0 : index
    %22 = vector.load %arg3[%c1_13, %c0_14, %c0_15] : memref<5x1x128xbf16, #tpu.memory_space<vmem>>, vector<1x1x128xbf16>
    %23 = vector.shape_cast %22 : vector<1x1x128xbf16> to vector<1x128xbf16>
    %24 = arith.extf %23 : vector<1x128xbf16> to vector<1x128xf32>
    %cst_16 = arith.constant dense<0.000000e+00> : vector<16x128xf32>
    %25 = tpu.matmul %19, %21, %cst_16 {dimension_numbers = #tpu.dot_dimension_numbers<[1], [0], [0], [1], [0, 0, 1, 1], [], []>} : vector<16x128xbf16>, vector<128x128xbf16>, vector<16x128xf32> -> vector<16x128xf32>
    %26 = vector.broadcast %24 : vector<1x128xf32> to vector<16x128xf32>
    %27 = arith.addf %25, %26 : vector<16x128xf32>
    %cst_17 = arith.constant 0.000000e+00 : f32
    %28 = vector.broadcast %cst_17 : f32 to vector<16x128xf32>
    %29 = arith.cmpf ogt, %27, %28 : vector<16x128xf32>
    %30 = math.exp %27 : vector<16x128xf32>
    %cst_18 = arith.constant 1.000000e+00 : f32
    %31 = vector.broadcast %cst_18 : f32 to vector<16x128xf32>
    %32 = arith.subf %30, %31 : vector<16x128xf32>
    %cst_19 = arith.constant 1.67326319 : f32
    %33 = vector.broadcast %cst_19 : f32 to vector<16x128xf32>
    %34 = arith.mulf %33, %32 : vector<16x128xf32>
    %35 = arith.select %29, %27, %34 : vector<16x128xi1>, vector<16x128xf32>
    %cst_20 = arith.constant 1.05070102 : f32
    %36 = vector.broadcast %cst_20 : f32 to vector<16x128xf32>
    %37 = arith.mulf %36, %35 : vector<16x128xf32>
    %38 = arith.truncf %37 : vector<16x128xf32> to vector<16x128xbf16>
    %c2 = arith.constant 2 : index
    %c0_21 = arith.constant 0 : index
    %c0_22 = arith.constant 0 : index
    %39 = vector.load %arg2[%c2, %c0_21, %c0_22] : memref<5x128x128xbf16, #tpu.memory_space<vmem>>, vector<1x128x128xbf16>
    %40 = vector.shape_cast %39 : vector<1x128x128xbf16> to vector<128x128xbf16>
    %c2_23 = arith.constant 2 : index
    %c0_24 = arith.constant 0 : index
    %c0_25 = arith.constant 0 : index
    %41 = vector.load %arg3[%c2_23, %c0_24, %c0_25] : memref<5x1x128xbf16, #tpu.memory_space<vmem>>, vector<1x1x128xbf16>
    %42 = vector.shape_cast %41 : vector<1x1x128xbf16> to vector<1x128xbf16>
    %43 = arith.extf %42 : vector<1x128xbf16> to vector<1x128xf32>
    %cst_26 = arith.constant dense<0.000000e+00> : vector<16x128xf32>
    %44 = tpu.matmul %38, %40, %cst_26 {dimension_numbers = #tpu.dot_dimension_numbers<[1], [0], [0], [1], [0, 0, 1, 1], [], []>} : vector<16x128xbf16>, vector<128x128xbf16>, vector<16x128xf32> -> vector<16x128xf32>
    %45 = vector.broadcast %43 : vector<1x128xf32> to vector<16x128xf32>
    %46 = arith.addf %44, %45 : vector<16x128xf32>
    %cst_27 = arith.constant 0.000000e+00 : f32
    %47 = vector.broadcast %cst_27 : f32 to vector<16x128xf32>
    %48 = arith.cmpf ogt, %46, %47 : vector<16x128xf32>
    %49 = math.exp %46 : vector<16x128xf32>
    %cst_28 = arith.constant 1.000000e+00 : f32
    %50 = vector.broadcast %cst_28 : f32 to vector<16x128xf32>
    %51 = arith.subf %49, %50 : vector<16x128xf32>
    %cst_29 = arith.constant 1.67326319 : f32
    %52 = vector.broadcast %cst_29 : f32 to vector<16x128xf32>
    %53 = arith.mulf %52, %51 : vector<16x128xf32>
    %54 = arith.select %48, %46, %53 : vector<16x128xi1>, vector<16x128xf32>
    %cst_30 = arith.constant 1.05070102 : f32
    %55 = vector.broadcast %cst_30 : f32 to vector<16x128xf32>
    %56 = arith.mulf %55, %54 : vector<16x128xf32>
    %57 = arith.truncf %56 : vector<16x128xf32> to vector<16x128xbf16>
    %c3 = arith.constant 3 : index
    %c0_31 = arith.constant 0 : index
    %c0_32 = arith.constant 0 : index
    %58 = vector.load %arg2[%c3, %c0_31, %c0_32] : memref<5x128x128xbf16, #tpu.memory_space<vmem>>, vector<1x128x128xbf16>
    %59 = vector.shape_cast %58 : vector<1x128x128xbf16> to vector<128x128xbf16>
    %c3_33 = arith.constant 3 : index
    %c0_34 = arith.constant 0 : index
    %c0_35 = arith.constant 0 : index
    %60 = vector.load %arg3[%c3_33, %c0_34, %c0_35] : memref<5x1x128xbf16, #tpu.memory_space<vmem>>, vector<1x1x128xbf16>
    %61 = vector.shape_cast %60 : vector<1x1x128xbf16> to vector<1x128xbf16>
    %62 = arith.extf %61 : vector<1x128xbf16> to vector<1x128xf32>
    %cst_36 = arith.constant dense<0.000000e+00> : vector<16x128xf32>
    %63 = tpu.matmul %57, %59, %cst_36 {dimension_numbers = #tpu.dot_dimension_numbers<[1], [0], [0], [1], [0, 0, 1, 1], [], []>} : vector<16x128xbf16>, vector<128x128xbf16>, vector<16x128xf32> -> vector<16x128xf32>
    %64 = vector.broadcast %62 : vector<1x128xf32> to vector<16x128xf32>
    %65 = arith.addf %63, %64 : vector<16x128xf32>
    %cst_37 = arith.constant 0.000000e+00 : f32
    %66 = vector.broadcast %cst_37 : f32 to vector<16x128xf32>
    %67 = arith.cmpf ogt, %65, %66 : vector<16x128xf32>
    %68 = math.exp %65 : vector<16x128xf32>
    %cst_38 = arith.constant 1.000000e+00 : f32
    %69 = vector.broadcast %cst_38 : f32 to vector<16x128xf32>
    %70 = arith.subf %68, %69 : vector<16x128xf32>
    %cst_39 = arith.constant 1.67326319 : f32
    %71 = vector.broadcast %cst_39 : f32 to vector<16x128xf32>
    %72 = arith.mulf %71, %70 : vector<16x128xf32>
    %73 = arith.select %67, %65, %72 : vector<16x128xi1>, vector<16x128xf32>
    %cst_40 = arith.constant 1.05070102 : f32
    %74 = vector.broadcast %cst_40 : f32 to vector<16x128xf32>
    %75 = arith.mulf %74, %73 : vector<16x128xf32>
    %76 = arith.truncf %75 : vector<16x128xf32> to vector<16x128xbf16>
    %c4 = arith.constant 4 : index
    %c0_41 = arith.constant 0 : index
    %c0_42 = arith.constant 0 : index
    %77 = vector.load %arg2[%c4, %c0_41, %c0_42] : memref<5x128x128xbf16, #tpu.memory_space<vmem>>, vector<1x128x128xbf16>
    %78 = vector.shape_cast %77 : vector<1x128x128xbf16> to vector<128x128xbf16>
    %c4_43 = arith.constant 4 : index
    %c0_44 = arith.constant 0 : index
    %c0_45 = arith.constant 0 : index
    %79 = vector.load %arg3[%c4_43, %c0_44, %c0_45] : memref<5x1x128xbf16, #tpu.memory_space<vmem>>, vector<1x1x128xbf16>
    %80 = vector.shape_cast %79 : vector<1x1x128xbf16> to vector<1x128xbf16>
    %81 = arith.extf %80 : vector<1x128xbf16> to vector<1x128xf32>
    %cst_46 = arith.constant dense<0.000000e+00> : vector<16x128xf32>
    %82 = tpu.matmul %76, %78, %cst_46 {dimension_numbers = #tpu.dot_dimension_numbers<[1], [0], [0], [1], [0, 0, 1, 1], [], []>} : vector<16x128xbf16>, vector<128x128xbf16>, vector<16x128xf32> -> vector<16x128xf32>
    %83 = vector.broadcast %81 : vector<1x128xf32> to vector<16x128xf32>
    %84 = arith.addf %82, %83 : vector<16x128xf32>
    %cst_47 = arith.constant 0.000000e+00 : f32
    %85 = vector.broadcast %cst_47 : f32 to vector<16x128xf32>
    %86 = arith.cmpf ogt, %84, %85 : vector<16x128xf32>
    %87 = math.exp %84 : vector<16x128xf32>
    %cst_48 = arith.constant 1.000000e+00 : f32
    %88 = vector.broadcast %cst_48 : f32 to vector<16x128xf32>
    %89 = arith.subf %87, %88 : vector<16x128xf32>
    %cst_49 = arith.constant 1.67326319 : f32
    %90 = vector.broadcast %cst_49 : f32 to vector<16x128xf32>
    %91 = arith.mulf %90, %89 : vector<16x128xf32>
    %92 = arith.select %86, %84, %91 : vector<16x128xi1>, vector<16x128xf32>
    %cst_50 = arith.constant 1.05070102 : f32
    %93 = vector.broadcast %cst_50 : f32 to vector<16x128xf32>
    %94 = arith.mulf %93, %92 : vector<16x128xf32>
    %95 = tpu.iota {dimensions = array<i32: 1>} : vector<16x128xi32>
    %c10_i32 = arith.constant 10 : i32
    %96 = vector.broadcast %c10_i32 : i32 to vector<16x128xi32>
    %97 = arith.cmpi slt, %95, %96 : vector<16x128xi32>
    %cst_51 = arith.constant 0xFF800000 : f32
    %98 = vector.broadcast %cst_51 : f32 to vector<16x128xf32>
    %99 = arith.select %97, %94, %98 : vector<16x128xi1>, vector<16x128xf32>
    %cst_52 = arith.constant dense<0xFF800000> : vector<16xf32>
    %100 = vector.multi_reduction <maximumf>, %99, %cst_52 [1] : vector<16x128xf32> to vector<16xf32>
    %101 = vector.shape_cast %100 : vector<16xf32> to vector<16x1xf32>
    %102 = vector.broadcast %101 : vector<16x1xf32> to vector<16x128xf32>
    %103 = arith.subf %99, %102 : vector<16x128xf32>
    %104 = math.exp %103 : vector<16x128xf32>
    %cst_53 = arith.constant 0.000000e+00 : f32
    %105 = vector.broadcast %cst_53 : f32 to vector<16x128xf32>
    %106 = arith.select %97, %104, %105 : vector<16x128xi1>, vector<16x128xf32>
    %cst_54 = arith.constant dense<0.000000e+00> : vector<16xf32>
    %107 = vector.multi_reduction <add>, %106, %cst_54 [1] : vector<16x128xf32> to vector<16xf32>
    %108 = vector.shape_cast %107 : vector<16xf32> to vector<16x1xf32>
    %109 = math.log %108 : vector<16x1xf32>
    %110 = vector.broadcast %109 : vector<16x1xf32> to vector<16x128xf32>
    %111 = arith.subf %103, %110 : vector<16x128xf32>
    %112 = arith.truncf %111 : vector<16x128xf32> to vector<16x128xbf16>
    %c0_55 = arith.constant 0 : index
    %c0_56 = arith.constant 0 : index
    %113 = vector.load %arg4[%c0_55, %c0_56] : memref<16x128xbf16, #tpu.memory_space<vmem>>, vector<16x128xbf16>
    tpu.vector_store %arg4[%c0_55, %c0_56], %112 {strides = array<i32>} : memref<16x128xbf16, #tpu.memory_space<vmem>>, vector<16x128xbf16>,
    return
  }
  func.func @transform_0(%arg0: i32) -> (i32, i32) {
    %c0_i32 = arith.constant 0 : i32
    %c0_i32_0 = arith.constant 0 : i32
    return %arg0, %c0_i32 : i32, i32
  }
  func.func @transform_1(%arg0: i32) -> (i32, i32, i32) {
    %c0_i32 = arith.constant 0 : i32
    %c0_i32_0 = arith.constant 0 : i32
    %c0_i32_1 = arith.constant 0 : i32
    %c0_i32_2 = arith.constant 0 : i32
    return %c0_i32, %c0_i32_0, %c0_i32_1 : i32, i32, i32
  }
  func.func @transform_2(%arg0: i32) -> (i32, i32, i32) {
    %c0_i32 = arith.constant 0 : i32
    %c0_i32_0 = arith.constant 0 : i32
    %c0_i32_1 = arith.constant 0 : i32
    %c0_i32_2 = arith.constant 0 : i32
    return %c0_i32, %c0_i32_0, %c0_i32_1 : i32, i32, i32
  }
  func.func @transform_3(%arg0: i32) -> (i32, i32) {
    %c0_i32 = arith.constant 0 : i32
    %c0_i32_0 = arith.constant 0 : i32
    return %arg0, %c0_i32 : i32, i32
  }
}

</mosaic_0001>

<bundles_post_ra>
// kernel: tpu_custom_call.1
= control target key start
LH: loop header
LB: loop body
LE: loop exit
PB: predicated region body
PF: predicated region fallthrough
CT: control target
= control target key end

     0   :  { %8 = vsyncpa [#allocation3], 0  ;;  %s1198_s0 = inlined_call_operand.vmem [shape: bf16[16,128], index: 0, kind: input, shape index: {}]   ;;  %s1199_s1 = inlined_call_operand.hbm [shape: bf16[5,128,128], index: 1, kind: input, shape index: {}]   ;;  %s1200_s2 = inlined_call_operand.vmem [shape: bf16[5,1,128], index: 2, kind: input, shape index: {}]   ;;  %s1201_s3 = inlined_call_operand.hbm [shape: bf16[16,128], index: 3, kind: output, shape index: {}]  }
   0x1   :  { %9 = vsyncpa [#allocation4], 0  ;;  %s1061_s12 = smov [#allocation2]   ;;  %s1013_s16 = scalar_lea.hbm %s1199_s1, 5120 }
   0x2   :  { %s17_s13 = sshll.u32 %s1061_s12, 4  ;;  %p1014_p0 = scmp.ne.s32.totalorder %s1199_s1, %s1013_s16  ;;  %s18_s13 = int_to_ptr.vmem [resolvable:$true] %s17_s13 }
   0x3   :  { %p1017_p1 = scmp.lt.u32.totalorder %s1013_s16, %s1199_s1 }
   0x5   :  { %p1019_p2 = pnand %p1017_p1, %p1014_p0 }
   0x7   :  { %1022 = shalt.err (!%p1019_p2)
}
   0x8   :  { %s1023_s21 = scalar_lea.vmem %s18_s13, 5120  ;;  %p1028_p4 = scmp.lt.s32.totalorder %s18_s13, %s18_s13 }
   0x9   :  { %p1024_p3 = scmp.ne.s32.totalorder %s18_s13, %s1023_s21  ;;  %p1029_p5 = scmp.lt.s32.totalorder %s1023_s21, %s1023_s21 }
   0xb   :  { %p1030_p6 = por %p1029_p5, %p1028_p4 }
   0xd   :  { %p1031_p7 = pnand %p1030_p6, %p1024_p3 }
   0xf   :  { %1034 = shalt.err (!%p1031_p7)
}
  0x10   :  { %s1062_s22 = smov 64   ;;  %s1063_s23 = smov 4  }
  0x11   :  { %23 = dma.hbm_to_vmem [thread:$0]  %s1199_s1, 5120, %s18_s13, [#allocation3], %s1062_s22, %s1062_s22, %s1063_s23  }
  0x12   :  { %1057 = dma.done.wait [#allocation3], 5120  }
  0x13   :  { %1058 = vsyncadd [#allocation3], 4294962176  ;;  %v1064_v0 = vmov 0.0   ;;  %vm1065_vm0 = vmmov 0   ;;  %v944_v1 = vld [vmem:[#allocation2] sm:$0xff]   ;;  %v945_v2 = vld [vmem:[#allocation2 + $0x8] sm:$0xff]   ;;  %v50_v19 = vlaneseq }
  0x14   :  { %838 = vmatprep.subr.bf16.mxu0 %v1064_v0  ;;  %854 = vmatprep.mubr.msk.bf16.mxu0 %vm1065_vm0, %v1064_v0  ;;  %v946_v3 = vld [vmem:[#allocation2 + $0x10] sm:$0xff]   ;;  %v953_v4 = vld [vmem:[#allocation2 + $0x40] sm:$0xff]   ;;  %v947_v5 = vld [vmem:[#allocation2 + $0x18] sm:$0xff]  }
  0x15   :  { %858 = vmatprep.subr.bf16.mxu1 %v1064_v0  ;;  %874 = vmatprep.mubr.msk.bf16.mxu1 %vm1065_vm0, %v1064_v0  ;;  %v948_v6 = vld [vmem:[#allocation2 + $0x20] sm:$0xff]   ;;  %v949_v7 = vld [vmem:[#allocation2 + $0x28] sm:$0xff]   ;;  %v950_v8 = vld [vmem:[#allocation2 + $0x30] sm:$0xff]   ;;  %v51_v20 = vshrl.u32 %v50_v19, 7 }
  0x16   :  { %839 = vmatpush3.bf16.msra.mxu0 %v944_v1  ;;  %859 = vmatpush3.bf16.msra.mxu1 %v953_v4  ;;  %v951_v9 = vld [vmem:[#allocation2 + $0x38] sm:$0xff]   ;;  %v952_v10 = vld [vmem:[%s1198_s0] sm:$0xff]   ;;  %v954_v11 = vld [vmem:[#allocation2 + $0x48] sm:$0xff]  }
  0x17   :  { %840 = vmatprep.subr.bf16.mxu0 %v1064_v0  ;;  %860 = vmatprep.subr.bf16.mxu1 %v1064_v0  ;;  %v955_v12 = vld [vmem:[#allocation2 + $0x50] sm:$0xff]   ;;  %v956_v13 = vld [vmem:[#allocation2 + $0x58] sm:$0xff]   ;;  %v957_v14 = vld [vmem:[#allocation2 + $0x60] sm:$0xff]   ;;  %v1134_v23 = vsub.s32 0, %v51_v20 }
  0x18   :  { %v958_v15 = vld [vmem:[#allocation2 + $0x68] sm:$0xff]   ;;  %v959_v16 = vld [vmem:[#allocation2 + $0x70] sm:$0xff]   ;;  %v960_v17 = vld [vmem:[#allocation2 + $0x78] sm:$0xff]  }
  0x19   :  { %v961_v18 = vld [vmem:[#allocation2 + $0x80] sm:$0xff]   ;;  %v962_v44 = vld [vmem:[#allocation2 + $0x88] sm:$0xff]   ;;  %v963_v45 = vld [vmem:[#allocation2 + $0x90] sm:$0xff]  }
  0x1a   :  { %841 = vmatpush3.bf16.msra.mxu0 %v945_v2  ;;  %861 = vmatpush3.bf16.msra.mxu1 %v954_v11  ;;  %v48_v21 = vld [vmem:[%s1200_s2] sm:$0x1]  ;;  %v964_v46 = vld [vmem:[#allocation2 + $0x98] sm:$0xff]   ;;  %v966_v48 = vld [vmem:[#allocation2 + $0xa8] sm:$0xff]  }
  0x1b   :  { %842 = vmatprep.subr.bf16.mxu0 %v1064_v0  ;;  %862 = vmatprep.subr.bf16.mxu1 %v1064_v0  ;;  %v49_v22 = vunpack.c.l.bf16 %v48_v21  ;;  %v965_v47 = vld [vmem:[#allocation2 + $0xa0] sm:$0xff]   ;;  %v967_v49 = vld [vmem:[#allocation2 + $0xb0] sm:$0xff]   ;;  %v968_v50 = vld [vmem:[#allocation2 + $0xb8] sm:$0xff]  }
  0x1c   :  { %v969_v51 = vld [vmem:[#allocation2 + $0xc0] sm:$0xff]   ;;  %v970_v11 = vld [vmem:[#allocation2 + $0xc8] sm:$0xff]  }
  0x1d   :  { %v53_v24 = vrot.slane %v49_v22, %v1134_v23  ;;  %v740_v52 = vld [vmem:[%s1200_s2 + $0x1] sm:$0x1]  ;;  %v751_v20 = vld [vmem:[%s1200_s2 + $0x2] sm:$0x1] }
  0x1e   :  { %843 = vmatpush3.bf16.msra.mxu0 %v946_v3  ;;  %863 = vmatpush3.bf16.msra.mxu1 %v955_v12  ;;  %v183_v53 = vunpack.c.l.bf16 %v740_v52  ;;  %v971_v12 = vld [vmem:[#allocation2 + $0xd0] sm:$0xff]   ;;  %v311_v21 = vunpack.c.l.bf16 %v751_v20 }
  0x1f   :  { %844 = vmatprep.subr.bf16.mxu0 %v1064_v0  ;;  %864 = vmatprep.subr.bf16.mxu1 %v1064_v0 }
  0x20   :  { %v187_v54 = vrot.slane %v183_v53, %v1134_v23  ;;  %v315_v22 = vrot.slane %v311_v21, %v1134_v23 }
  0x22   :  { %845 = vmatpush3.bf16.msra.mxu0 %v947_v5  ;;  %865 = vmatpush3.bf16.msra.mxu1 %v956_v13  ;;  %v972_v13 = vld [vmem:[#allocation2 + $0xd8] sm:$0xff]  }
  0x23   :  { %846 = vmatprep.subr.bf16.mxu0 %v1064_v0  ;;  %866 = vmatprep.subr.bf16.mxu1 %v1064_v0 }
  0x26   :  { %847 = vmatpush3.bf16.msra.mxu0 %v948_v6  ;;  %867 = vmatpush3.bf16.msra.mxu1 %v957_v14  ;;  %v973_v14 = vld [vmem:[#allocation2 + $0xe0] sm:$0xff]  }
  0x27   :  { %848 = vmatprep.subr.bf16.mxu0 %v1064_v0  ;;  %868 = vmatprep.subr.bf16.mxu1 %v1064_v0 }
  0x2a   :  { %849 = vmatpush3.bf16.msra.mxu0 %v949_v7  ;;  %869 = vmatpush3.bf16.msra.mxu1 %v958_v15  ;;  %v974_v15 = vld [vmem:[#allocation2 + $0xe8] sm:$0xff]  }
  0x2b   :  { %850 = vmatprep.subr.bf16.mxu0 %v1064_v0  ;;  %870 = vmatprep.subr.bf16.mxu1 %v1064_v0 }
  0x2e   :  { %851 = vmatpush3.bf16.msra.mxu0 %v950_v8  ;;  %871 = vmatpush3.bf16.msra.mxu1 %v959_v16  ;;  %v975_v16 = vld [vmem:[#allocation2 + $0xf0] sm:$0xff]  }
  0x2f   :  { %852 = vmatprep.subr.bf16.mxu0 %v1064_v0  ;;  %872 = vmatprep.subr.bf16.mxu1 %v1064_v0 }
  0x32   :  { %853 = vmatpush3.bf16.msra.mxu0 %v951_v9  ;;  %873 = vmatpush3.bf16.msra.mxu1 %v960_v17  ;;  %v976_v17 = vld [vmem:[#allocation2 + $0xf8] sm:$0xff]  }
  0x33   :  { %878 = vmatprep.subr.bf16.mxu0 %v1064_v0  ;;  %898 = vmatprep.subr.bf16.mxu1 %v1064_v0 }
  0x35   :  { %855 = vmatmul.mubr.bf16.vlgmr.msra.gmra.mrb[0].mxu0 %v952_v10 }
  0x36   :  { %894 = vmatprep.mubr.msk.bf16.mxu0 %vm1065_vm0, %v1064_v0  ;;  %879 = vmatpush3.bf16.msra.mxu0 %v961_v18  ;;  %v977_v18 = vld [vmem:[#allocation2 + $0x100] sm:$0xff]  }
  0x37   :  { %880 = vmatprep.subr.bf16.mxu0 %v1064_v0 }
  0x3a   :  { %881 = vmatpush3.bf16.msra.mxu0 %v962_v44  ;;  %v979_v44 = vld [vmem:[#allocation2 + $0x110] sm:$0xff]  }
  0x3b   :  { %882 = vmatprep.subr.bf16.mxu0 %v1064_v0 }
  0x3e   :  { %883 = vmatpush3.bf16.msra.mxu0 %v963_v45  ;;  %v980_v45 = vld [vmem:[#allocation2 + $0x118] sm:$0xff]  }
  0x3f   :  { %884 = vmatprep.subr.bf16.mxu0 %v1064_v0 }
  0x42   :  { %885 = vmatpush3.bf16.msra.mxu0 %v964_v46  ;;  %v981_v46 = vld [vmem:[#allocation2 + $0x120] sm:$0xff]  }
  0x43   :  { %886 = vmatprep.subr.bf16.mxu0 %v1064_v0 }
  0x46   :  { %887 = vmatpush3.bf16.msra.mxu0 %v965_v47  ;;  %v982_v47 = vld [vmem:[#allocation2 + $0x128] sm:$0xff]  }
  0x47   :  { %888 = vmatprep.subr.bf16.mxu0 %v1064_v0 }
  0x4a   :  { %889 = vmatpush3.bf16.msra.mxu0 %v966_v48  ;;  %v983_v48 = vld [vmem:[#allocation2 + $0x130] sm:$0xff]  }
  0x4b   :  { %890 = vmatprep.subr.bf16.mxu0 %v1064_v0 }
  0x4e   :  { %891 = vmatpush3.bf16.msra.mxu0 %v967_v49  ;;  %v984_v49 = vld [vmem:[#allocation2 + $0x138] sm:$0xff]  }
  0x4f   :  { %892 = vmatprep.subr.bf16.mxu0 %v1064_v0 }
  0x52   :  { %893 = vmatpush3.bf16.msra.mxu0 %v968_v50  ;;  %v762_v50 = vld [vmem:[%s1200_s2 + $0x3] sm:$0x1] }
  0x53   :  { %918 = vmatprep.subr.bf16.mxu0 %v1064_v0 }
 0x108   :  { %v142_v25 = vpop.f32.mrb[0].mxu0 }
 0x109   :  { %v143_v26 = vadd.f32 %v142_v25, %v53_v24  ;;  %v856_v27 = vpop.f32.mrb[1].mxu0 }
 0x10a   :  { %v145_v28 = vpop.f32.mrb[2].mxu0 }
 0x10b   :  { %v151_v29 = vmul.f32 1.442695, %v143_v26  ;;  %v146_v30 = vadd.f32 %v145_v28, %v53_v24  ;;  %v857_v31 = vpop.f32.mrb[3].mxu0  ;;  %vm149_vm1 = vcmp.gt.f32.partialorder %v143_v26, 0.0 }
 0x10d   :  { %985 = vpow2.f32 %v151_v29  ;;  %v153_v32 = vmul.f32 1.442695, %v146_v30  ;;  %vm150_vm2 = vcmp.gt.f32.partialorder %v146_v30, 0.0 }
 0x10f   :  { %987 = vpow2.f32 %v153_v32 }
 0x117   :  { %v986_v33 = vpop.eup %985 }
 0x118   :  { %v738_v34 = vadd.f32 -1.0, %v986_v33 }
 0x119   :  { %v988_v35 = vpop.eup %987 }
 0x11a   :  { %v157_v36 = vmul.f32 1.6732632, %v738_v34  ;;  %v739_v37 = vadd.f32 -1.0, %v988_v35 }
 0x11c   :  { %v159_v38 = vsel %vm149_vm1, %v143_v26, %v157_v36  ;;  %v158_v39 = vmul.f32 1.6732632, %v739_v37 }
 0x11d   :  { %v161_v41 = vmul.f32 1.050701, %v159_v38 }
 0x11e   :  { %v160_v40 = vsel %vm150_vm2, %v146_v30, %v158_v39 }
 0x11f   :  { %v162_v42 = vmul.f32 1.050701, %v160_v40 }
 0x121   :  { %v163_v43 = vpack.c.bf16 %v162_v42, %v161_v41 }
 0x123   :  { %875 = vmatmul.mubr.bf16.vlgmr.msra.gmra.mrb[0].mxu1 %v163_v43  ;;  %v978_v43 = vld [vmem:[#allocation2 + $0x108] sm:$0xff]  }
 0x124   :  { %914 = vmatprep.mubr.msk.bf16.mxu1 %vm1065_vm0, %v1064_v0  ;;  %899 = vmatpush3.bf16.msra.mxu1 %v969_v51  ;;  %v439_v51 = vunpack.c.l.bf16 %v762_v50 }
 0x125   :  { %900 = vmatprep.subr.bf16.mxu1 %v1064_v0 }
 0x126   :  { %v443_v52 = vrot.slane %v439_v51, %v1134_v23 }
 0x128   :  { %901 = vmatpush3.bf16.msra.mxu1 %v970_v11 }
 0x129   :  { %902 = vmatprep.subr.bf16.mxu1 %v1064_v0 }
 0x12c   :  { %903 = vmatpush3.bf16.msra.mxu1 %v971_v12 }
 0x12d   :  { %904 = vmatprep.subr.bf16.mxu1 %v1064_v0 }
 0x130   :  { %905 = vmatpush3.bf16.msra.mxu1 %v972_v13 }
 0x131   :  { %906 = vmatprep.subr.bf16.mxu1 %v1064_v0 }
 0x134   :  { %907 = vmatpush3.bf16.msra.mxu1 %v973_v14 }
 0x135   :  { %908 = vmatprep.subr.bf16.mxu1 %v1064_v0 }
 0x138   :  { %909 = vmatpush3.bf16.msra.mxu1 %v974_v15 }
 0x139   :  { %910 = vmatprep.subr.bf16.mxu1 %v1064_v0 }
 0x13c   :  { %911 = vmatpush3.bf16.msra.mxu1 %v975_v16 }
 0x13d   :  { %912 = vmatprep.subr.bf16.mxu1 %v1064_v0 }
 0x140   :  { %913 = vmatpush3.bf16.msra.mxu1 %v976_v17 }
 0x1f6   :  { %v270_v55 = vpop.f32.mrb[0].mxu1 }
 0x1f7   :  { %v271_v56 = vadd.f32 %v270_v55, %v187_v54  ;;  %v876_v57 = vpop.f32.mrb[1].mxu1 }
 0x1f8   :  { %v273_v58 = vpop.f32.mrb[2].mxu1 }
 0x1f9   :  { %v279_v59 = vmul.f32 1.442695, %v271_v56  ;;  %v274_v60 = vadd.f32 %v273_v58, %v187_v54  ;;  %v877_v61 = vpop.f32.mrb[3].mxu1  ;;  %vm277_vm3 = vcmp.gt.f32.partialorder %v271_v56, 0.0 }
 0x1fb   :  { %989 = vpow2.f32 %v279_v59  ;;  %v281_v62 = vmul.f32 1.442695, %v274_v60  ;;  %vm278_vm4 = vcmp.gt.f32.partialorder %v274_v60, 0.0 }
 0x1fd   :  { %991 = vpow2.f32 %v281_v62 }
 0x205   :  { %v990_v63 = vpop.eup %989 }
 0x206   :  { %v749_v1 = vadd.f32 -1.0, %v990_v63 }
 0x207   :  { %v992_v2 = vpop.eup %991 }
 0x208   :  { %v285_v3 = vmul.f32 1.6732632, %v749_v1  ;;  %v750_v4 = vadd.f32 -1.0, %v992_v2 }
 0x20a   :  { %v287_v5 = vsel %vm277_vm3, %v271_v56, %v285_v3  ;;  %v286_v6 = vmul.f32 1.6732632, %v750_v4 }
 0x20b   :  { %v289_v8 = vmul.f32 1.050701, %v287_v5 }
 0x20c   :  { %v288_v7 = vsel %vm278_vm4, %v274_v60, %v286_v6 }
 0x20d   :  { %v290_v9 = vmul.f32 1.050701, %v288_v7 }
 0x20f   :  { %v291_v10 = vpack.c.bf16 %v290_v9, %v289_v8  ;;  %v773_v8 = vld [vmem:[%s1200_s2 + $0x4] sm:$0x1]  ;;  %s1066_s2 = smov [#allocation5]  }
 0x210   :  { %v567_v9 = vunpack.c.l.bf16 %v773_v8  ;;  %s717_s9 = sshll.u32 %s1066_s2, 4  ;;  %s718_s9 = int_to_ptr.vmem [resolvable:$true] %s717_s9 }
 0x211   :  { %895 = vmatmul.mubr.bf16.vlgmr.msra.gmra.mrb[4].mxu0 %v291_v10  ;;  %s1035_s10 = scalar_lea.vmem %s718_s9, 128  ;;  %p1040_p9 = scmp.lt.s32.totalorder %s718_s9, %s718_s9 }
 0x212   :  { %934 = vmatprep.mubr.msk.bf16.mxu0 %vm1065_vm0, %v1064_v0  ;;  %919 = vmatpush3.bf16.msra.mxu0 %v977_v18  ;;  %v571_v10 = vrot.slane %v567_v9, %v1134_v23  ;;  %p1036_p8 = scmp.ne.s32.totalorder %s718_s9, %s1035_s10  ;;  %p1041_p10 = scmp.lt.s32.totalorder %s1035_s10, %s1035_s10 }
 0x213   :  { %920 = vmatprep.subr.bf16.mxu0 %v1064_v0 }
 0x214   :  { %p1042_p11 = por %p1041_p10, %p1040_p9 }
 0x216   :  { %921 = vmatpush3.bf16.msra.mxu0 %v978_v43  ;;  %p1043_p12 = pnand %p1042_p11, %p1036_p8 }
 0x217   :  { %922 = vmatprep.subr.bf16.mxu0 %v1064_v0 }
 0x21a   :  { %923 = vmatpush3.bf16.msra.mxu0 %v979_v44 }
 0x21b   :  { %924 = vmatprep.subr.bf16.mxu0 %v1064_v0 }
 0x21e   :  { %925 = vmatpush3.bf16.msra.mxu0 %v980_v45 }
 0x21f   :  { %926 = vmatprep.subr.bf16.mxu0 %v1064_v0 }
 0x222   :  { %927 = vmatpush3.bf16.msra.mxu0 %v981_v46 }
 0x223   :  { %928 = vmatprep.subr.bf16.mxu0 %v1064_v0 }
 0x226   :  { %929 = vmatpush3.bf16.msra.mxu0 %v982_v47 }
 0x227   :  { %930 = vmatprep.subr.bf16.mxu0 %v1064_v0 }
 0x22a   :  { %931 = vmatpush3.bf16.msra.mxu0 %v983_v48 }
 0x22b   :  { %932 = vmatprep.subr.bf16.mxu0 %v1064_v0 }
 0x22e   :  { %933 = vmatpush3.bf16.msra.mxu0 %v984_v49 }
 0x2e4   :  { %v398_v24 = vpop.f32.mrb[4].mxu0 }
 0x2e5   :  { %v399_v25 = vadd.f32 %v398_v24, %v315_v22  ;;  %v896_v26 = vpop.f32.mrb[5].mxu0 }
 0x2e6   :  { %v401_v27 = vpop.f32.mrb[6].mxu0 }
 0x2e7   :  { %v407_v28 = vmul.f32 1.442695, %v399_v25  ;;  %v402_v29 = vadd.f32 %v401_v27, %v315_v22  ;;  %v897_v30 = vpop.f32.mrb[7].mxu0  ;;  %vm405_vm5 = vcmp.gt.f32.partialorder %v399_v25, 0.0  ;;  %v676_v22 = vand.u32 127, %v50_v19 }
 0x2e9   :  { %993 = vpow2.f32 %v407_v28  ;;  %v409_v31 = vmul.f32 1.442695, %v402_v29  ;;  %vm406_vm6 = vcmp.gt.f32.partialorder %v402_v29, 0.0  ;;  %vm677_vm10 = vcmp.lt.s32.totalorder %v676_v22, 10 }
 0x2eb   :  { %995 = vpow2.f32 %v409_v31 }
 0x2f3   :  { %v994_v32 = vpop.eup %993 }
 0x2f4   :  { %v760_v33 = vadd.f32 -1.0, %v994_v32 }
 0x2f5   :  { %v996_v34 = vpop.eup %995 }
 0x2f6   :  { %v413_v35 = vmul.f32 1.6732632, %v760_v33  ;;  %v761_v36 = vadd.f32 -1.0, %v996_v34 }
 0x2f8   :  { %v415_v37 = vsel %vm405_vm5, %v399_v25, %v413_v35  ;;  %v414_v38 = vmul.f32 1.6732632, %v761_v36 }
 0x2f9   :  { %v417_v40 = vmul.f32 1.050701, %v415_v37 }
 0x2fa   :  { %v416_v39 = vsel %vm406_vm6, %v402_v29, %v414_v38 }
 0x2fb   :  { %v418_v41 = vmul.f32 1.050701, %v416_v39 }
 0x2fd   :  { %v419_v42 = vpack.c.bf16 %v418_v41, %v417_v40 }
 0x2ff   :  { %915 = vmatmul.mubr.bf16.vlgmr.msra.gmra.mrb[4].mxu1 %v419_v42 }
 0x3d2   :  { %v526_v53 = vpop.f32.mrb[4].mxu1 }
 0x3d3   :  { %v527_v54 = vadd.f32 %v526_v53, %v443_v52  ;;  %v916_v55 = vpop.f32.mrb[5].mxu1 }
 0x3d4   :  { %v529_v56 = vpop.f32.mrb[6].mxu1 }
 0x3d5   :  { %v535_v57 = vmul.f32 1.442695, %v527_v54  ;;  %v530_v58 = vadd.f32 %v529_v56, %v443_v52  ;;  %v917_v59 = vpop.f32.mrb[7].mxu1  ;;  %vm533_vm7 = vcmp.gt.f32.partialorder %v527_v54, 0.0 }
 0x3d7   :  { %997 = vpow2.f32 %v535_v57  ;;  %v537_v60 = vmul.f32 1.442695, %v530_v58  ;;  %vm534_vm8 = vcmp.gt.f32.partialorder %v530_v58, 0.0 }
 0x3d9   :  { %999 = vpow2.f32 %v537_v60 }
 0x3e1   :  { %v998_v0 = vpop.eup %997 }
 0x3e2   :  { %v771_v61 = vadd.f32 -1.0, %v998_v0 }
 0x3e3   :  { %v1000_v62 = vpop.eup %999 }
 0x3e4   :  { %v541_v63 = vmul.f32 1.6732632, %v771_v61  ;;  %v772_v1 = vadd.f32 -1.0, %v1000_v62 }
 0x3e6   :  { %v543_v2 = vsel %vm533_vm7, %v527_v54, %v541_v63  ;;  %v542_v3 = vmul.f32 1.6732632, %v772_v1 }
 0x3e7   :  { %v545_v5 = vmul.f32 1.050701, %v543_v2 }
 0x3e8   :  { %v544_v4 = vsel %vm534_vm8, %v530_v58, %v542_v3 }
 0x3e9   :  { %v546_v6 = vmul.f32 1.050701, %v544_v4 }
 0x3eb   :  { %v547_v7 = vpack.c.bf16 %v546_v6, %v545_v5 }
 0x3ed   :  { %935 = vmatmul.mubr.bf16.vlgmr.msra.gmra.mrb[8].mxu0 %v547_v7 }
 0x4c0   :  { %v654_v11 = vpop.f32.mrb[8].mxu0 }
 0x4c1   :  { %v655_v12 = vadd.f32 %v654_v11, %v571_v10  ;;  %v936_v13 = vpop.f32.mrb[9].mxu0 }
 0x4c2   :  { %v657_v14 = vpop.f32.mrb[10].mxu0 }
 0x4c3   :  { %v663_v15 = vmul.f32 1.442695, %v655_v12  ;;  %v658_v16 = vadd.f32 %v657_v14, %v571_v10  ;;  %v937_v17 = vpop.f32.mrb[11].mxu0  ;;  %vm661_vm9 = vcmp.gt.f32.partialorder %v655_v12, 0.0 }
 0x4c5   :  { %1001 = vpow2.f32 %v663_v15  ;;  %v665_v18 = vmul.f32 1.442695, %v658_v16  ;;  %vm662_vm11 = vcmp.gt.f32.partialorder %v658_v16, 0.0 }
 0x4c7   :  { %1003 = vpow2.f32 %v665_v18 }
 0x4cf   :  { %v1002_v20 = vpop.eup %1001 }
 0x4d0   :  { %v782_v21 = vadd.f32 -1.0, %v1002_v20 }
 0x4d1   :  { %v1004_v24 = vpop.eup %1003 }
 0x4d2   :  { %v669_v25 = vmul.f32 1.6732632, %v782_v21  ;;  %v783_v26 = vadd.f32 -1.0, %v1004_v24 }
 0x4d4   :  { %v671_v27 = vsel %vm661_vm9, %v655_v12, %v669_v25  ;;  %v670_v23 = vmul.f32 1.6732632, %v783_v26 }
 0x4d5   :  { %v673_v28 = vmul.f32 1.050701, %v671_v27 }
 0x4d6   :  { %v672_v29 = vsel %vm662_vm11, %v658_v16, %v670_v23 }
 0x4d7   :  { %v678_v30 = vsel %vm677_vm10, %v673_v28, -inf  ;;  %v674_v31 = vmul.f32 1.050701, %v672_v29 }
 0x4d8   :  { %680 = vmax.xlane.f32.xlu0 %v678_v30 }
 0x4d9   :  { %v679_v32 = vsel %vm677_vm10, %v674_v31, -inf }
 0x4dc   :  { %682 = vmax.xlane.f32.xlu0 %v679_v32 }
 0x565   :  { %v681_v33 = vpop.xlane.xlu0 %680 }
 0x566   :  { %v684_v34 = vsub.f32 %v678_v30, %v681_v33 }
 0x568   :  { %v686_v19 = vmul.f32 1.442695, %v684_v34 }
 0x569   :  { %v683_v35 = vpop.xlane.xlu0 %682 }
 0x56a   :  { %1005 = vpow2.f32 %v686_v19  ;;  %v685_v36 = vsub.f32 %v679_v32, %v683_v35 }
 0x56c   :  { %v688_v37 = vmul.f32 1.442695, %v685_v36 }
 0x56e   :  { %1007 = vpow2.f32 %v688_v37 }
 0x574   :  { %v1006_v38 = vpop.eup %1005 }
 0x575   :  { %v690_v39 = vsel %vm677_vm10, %v1006_v38, 0.0 }
 0x576   :  { %692 = vadd.xlane.f32.xlu1 %v690_v39 }
 0x578   :  { %v1008_v40 = vpop.eup %1007 }
 0x579   :  { %v691_v41 = vsel %vm677_vm10, %v1008_v40, 0.0 }
 0x57a   :  { %694 = vadd.xlane.f32.xlu1 %v691_v41 }
 0x603   :  { %v693_v42 = vpop.xlane.xlu1 %692 }
 0x604   :  { %1009 = vlog2.f32 %v693_v42 }
 0x607   :  { %v695_v43 = vpop.xlane.xlu1 %694 }
 0x608   :  { %1011 = vlog2.f32 %v695_v43 }
 0x60e   :  { %v1010_v44 = vpop.eup %1009 }
 0x60f   :  { %v697_v45 = vmul.f32 0.6931472, %v1010_v44 }
 0x611   :  { %v700_v48 = vsub.f32 %v684_v34, %v697_v45 }
 0x612   :  { %v1012_v46 = vpop.eup %1011 }
 0x613   :  { %v699_v47 = vmul.f32 0.6931472, %v1012_v46 }
 0x615   :  { %v701_v49 = vsub.f32 %v685_v36, %v699_v47 }
 0x617   :  { %v791_v50 = vpack.c.bf16 %v701_v49, %v700_v48 }
 0x619   :  { %792 = vst [vmem:[#allocation5] sm:$0xff] %v791_v50  }
 0x61a   :  { %1046 = shalt.err (!%p1043_p12)
}
 0x61b   :  { %s1047_s13 = scalar_lea.hbm %s1201_s3, 128 }
 0x61c   :  { %p1048_p13 = scmp.ne.s32.totalorder %s1201_s3, %s1047_s13  ;;  %p1051_p0 = scmp.lt.u32.totalorder %s1047_s13, %s1201_s3 }
 0x61e   :  { %p1053_p1 = pnand %p1051_p0, %p1048_p13 }
 0x620   :  { %1056 = shalt.err (!%p1053_p1)
}
 0x621   :  { %723 = dma.vmem_to_hbm [thread:$0]  %s718_s9, 128, %s1201_s3, [#allocation4], %s1062_s22, %s1062_s22, %s1063_s23  }
 0x622   :  { %1059 = dma.done.wait [#allocation4], 128  }
 0x623   :  { %1060 = vsyncadd [#allocation4], 4294967168 }
 0x624   :  { %727 = vsyncpa [#allocation3], 1 }
 0x625   :  { %728 = vsyncpa [#allocation4], 1 }

</bundles_post_ra>
